<compile_context>
chip_gen: v7x
topology: tpu7x:2x2x1
jax: 0.10.0
libtpu: 0.0.40
codegen_flags: <defaults>
</compile_context>

<pallas_src>
import jax
import jax.numpy as jnp
from jax.experimental import pallas as pl
from jax.experimental.pallas import tpu as pltpu


_ROWS_PER_GROUP = 8          # sublanes per f32 vreg -> unmasked (8, D) stores
_N_INFLIGHT_ROW_DMAS = 8     # concurrent row DMAs in the HBM-gather path
_MAX_IDX_PER_CALL = 1 << 17  # 1-D SMEM arrays pad to next_pow2(4N) bytes;
                             # 2^17 int32 indices -> 512 KiB SMEM per call.


def _gather_resident_kernel(idx_ref, tbl_ref, out_ref):
    """Gather rows of a VMEM-resident table into one (R, D) output tile."""
    i = pl.program_id(0)
    rows = out_ref.shape[0]                    # static tile height R (mult. of 8)
    base = i * rows

    @pl.loop(0, rows // _ROWS_PER_GROUP)
    def _(g):
        r0 = pl.multiple_of(g * _ROWS_PER_GROUP, _ROWS_PER_GROUP)
        # 8 independent scalar SMEM index reads + dynamic (1, D) VMEM row loads
        # that the scheduler can overlap; assembled into one (8, D) value and
        # written with a single unmasked store.
        rows8 = [
            tbl_ref[pl.ds(idx_ref[base + r0 + j], 1), :]
            for j in range(_ROWS_PER_GROUP)
        ]
        out_ref[pl.ds(r0, _ROWS_PER_GROUP), :] = jnp.concatenate(rows8, axis=0)


def _gather_dma_kernel(idx_ref, tbl_hbm, out_ref, sem):
    """Gather rows straight from an HBM-resident table with batched row DMAs."""
    i = pl.program_id(0)
    rows = out_ref.shape[0]
    base = i * rows

    @pl.loop(0, rows // _N_INFLIGHT_ROW_DMAS)
    def _(g):
        r0 = pl.multiple_of(g * _N_INFLIGHT_ROW_DMAS, _N_INFLIGHT_ROW_DMAS)

        def row_copy(j):
            row = idx_ref[base + r0 + j]          # cheap scalar SMEM read
            return pltpu.make_async_copy(
                tbl_hbm.at[pl.ds(row, 1), :],     # (1, D) row in HBM
                out_ref.at[pl.ds(r0 + j, 1), :],  # (1, D) slot of the out tile
                sem.at[j])

        copies = [row_copy(j) for j in range(_N_INFLIGHT_ROW_DMAS)]
        for c in copies:                          # 8 independent DMAs in flight
            c.start()
        for c in copies:                          # drain the batch
            c.wait()


def _round_up(x, m):
    return (x + m - 1) // m * m


def _vmem_capacity_bytes():
    try:
        return int(pltpu.get_tpu_info().vmem_capacity_bytes)
    except Exception:
        return 64 * 1024 * 1024   # conservative fallback (v7x per-TC VMEM)


def _gather_rows(flat_idx, table, *, rows_per_tile=512, force_path=None):
    """flat_idx: (n,) int32 row ids into table (V, D).  Returns (n, D)."""
    (n,) = flat_idx.shape
    V, D = table.shape
    itemsize = jnp.dtype(table.dtype).itemsize

    # Tile height: multiple of 8 sublanes, at most rows_per_tile, enough for n.
    R = min(int(rows_per_tile), _round_up(n, _ROWS_PER_GROUP))
    R = _round_up(R, _ROWS_PER_GROUP)
    n_tiles = pl.cdiv(n, R)
    padded_n = n_tiles * R

    # Pad the (cheap, SMEM-resident) index vector instead of the output.
    if padded_n > n:
        flat_idx = jnp.concatenate(
            [flat_idx, jnp.zeros((padded_n - n,), jnp.int32)])

    # Emit the exact output shape when n is 8-aligned (no post-kernel slice
    # copy); otherwise fall back to a padded output + slice.
    exact = (n % _ROWS_PER_GROUP == 0)
    out_rows = n if exact else padded_n

    table_bytes = V * D * itemsize
    gathered_bytes = padded_n * D * itemsize
    out_tile_bytes = 2 * R * D * itemsize          # double-buffered out block
    headroom = 2 << 20

    cap = _vmem_capacity_bytes()
    budget = int(0.80 * cap)
    resident_need = table_bytes + out_tile_bytes + headroom

    if force_path == "resident":
        use_dma = False
    elif force_path == "dma":
        use_dma = True
    else:
        # DMA-gather whenever the resident table would not fit comfortably in
        # VMEM, or it would read far more table bytes than the gather touches.
        use_dma = (resident_need > budget) or (table_bytes > 4 * gathered_bytes)

    if use_dma:
        kernel = _gather_dma_kernel
        in_specs = [pl.BlockSpec(memory_space=pl.ANY)]     # table stays in HBM
        scratch_shapes = [pltpu.SemaphoreType.DMA((_N_INFLIGHT_ROW_DMAS,))]
        vmem_need = out_tile_bytes + headroom
        bytes_accessed = 2 * gathered_bytes + 4 * padded_n
    else:
        kernel = _gather_resident_kernel
        in_specs = [pl.BlockSpec(memory_space=pltpu.MemorySpace.VMEM)]
        scratch_shapes = []
        vmem_need = resident_need
        bytes_accessed = table_bytes + gathered_bytes + 4 * padded_n

    # Always set the scoped-VMEM limit: v5e defaults to only 16 MiB, so even
    # "small" resident tables OOM without it; cap below physical VMEM.
    vmem_limit = int(min(max(vmem_need, 16 << 20), int(0.9 * cap)))

    # TODO(synk): on v7x use pltpu.CORE_PARALLEL (or pl.core_map) on the tile
    # axis to engage both TensorCores; plain "parallel" is kept because it is
    # safe on 1-TC chips and near-neutral otherwise.
    compiler_params = pltpu.CompilerParams(
        dimension_semantics=("parallel",),
        vmem_limit_bytes=vmem_limit,
    )

    cost = pl.CostEstimate(flops=0, transcendentals=0,
                           bytes_accessed=int(bytes_accessed))

    out = pl.pallas_call(
        kernel,
        out_shape=jax.ShapeDtypeStruct((out_rows, D), table.dtype),
        grid_spec=pltpu.PrefetchScalarGridSpec(
            num_scalar_prefetch=1,
            grid=(n_tiles,),
            in_specs=in_specs,
            out_specs=pl.BlockSpec((R, D), lambda i, idx: (i, 0)),
            scratch_shapes=scratch_shapes,
        ),
        compiler_params=compiler_params,
        cost_estimate=cost,
    )(flat_idx, table)

    return out if exact else out[:n]


def buckle_embedding_pallas(categorical_inputs, embedding_table, offsets,
                            *, rows_per_tile=512, force_path=None):
    """categorical_inputs: [B, F] int
       embedding_table:    [V, D] float  (V = sum(categorical_feature_sizes))
       offsets:            [F]   int     (cumsum([0] + sizes)[:-1])
       returns:            [B, F, D] with embedding_table's dtype
    """
    B, F = categorical_inputs.shape
    V, D = embedding_table.shape

    # Offset-adjust, flatten, clamp (glue, plain JAX).  NOTE: clamping maps
    # out-of-range ids to valid rows; PyTorch nn.Embedding would raise.
    flat_idx = (categorical_inputs.astype(jnp.int32)
                + offsets[None, :].astype(jnp.int32)).reshape(-1)
    flat_idx = jnp.clip(flat_idx, 0, V - 1)
    n = B * F

    if n <= _MAX_IDX_PER_CALL:
        out = _gather_rows(flat_idx, embedding_table,
                           rows_per_tile=rows_per_tile, force_path=force_path)
    else:
        # Chunk so each call's scalar-prefetch index vector stays within the
        # SMEM budget at production DLRM batch sizes.
        parts = []
        for s in range(0, n, _MAX_IDX_PER_CALL):
            parts.append(_gather_rows(flat_idx[s:s + _MAX_IDX_PER_CALL],
                                      embedding_table,
                                      rows_per_tile=rows_per_tile,
                                      force_path=force_path))
        out = jnp.concatenate(parts, axis=0)

    return out.reshape(B, F, D)


if __name__ == "__main__":
    # Small, deterministic setup consistent with the module.
    categorical_feature_sizes = [10, 20, 30, 40]   # F = 4 fused tables
    embedding_dim = 128
    B = 8
    F = len(categorical_feature_sizes)

    sizes = jnp.asarray(categorical_feature_sizes, dtype=jnp.int32)
    offsets_full = jnp.concatenate(
        [jnp.zeros((1,), jnp.int32), jnp.cumsum(sizes)]
    )                                    # like the registered buffer `offsets`
    offsets = offsets_full[:-1]          # per-feature row offsets
    total_rows = int(offsets_full[-1])   # sum(sizes)

    key = jax.random.PRNGKey(0)
    k_w, k_idx = jax.random.split(key)

    # Deterministic "pretrained" fused embedding table (synthetic init).
    # (f32 to match nn.Embedding; a bf16 table halves HBM traffic and the
    #  resident-table VMEM footprint — preferable on v7x.)
    embedding_table = jax.random.normal(
        k_w, (total_rows, embedding_dim), dtype=jnp.float32)

    # Per-feature categorical indices in [0, size_f).
    u = jax.random.uniform(k_idx, (B, F))
    categorical_inputs = jnp.floor(
        u * sizes[None, :].astype(jnp.float32)).astype(jnp.int32)

    # Reference (plain JAX gather).
    ref = jnp.take(embedding_table,
                   categorical_inputs + offsets[None, :], axis=0)

    # Exercise both gather paths, single-tile and multi-tile configurations.
    configs = [
        dict(force_path="resident", rows_per_tile=512),
        dict(force_path="dma", rows_per_tile=512),
        dict(force_path="resident", rows_per_tile=8),   # B*F/8 = 4 grid tiles
        dict(force_path="dma", rows_per_tile=8),
    ]
    for cfg in configs:
        out = buckle_embedding_pallas(categorical_inputs, embedding_table,
                                      offsets, **cfg)
        out = jax.block_until_ready(out)
        assert out.shape == (B, F, embedding_dim)
        assert jnp.allclose(out, ref), f"mismatch vs reference gather: {cfg}"

    print("KERNEL_OK")
</pallas_src>

<mosaic_0001>
module attributes {stable_mosaic.version = 11 : i64} {
  func.func @_gather_resident_kernel(%arg0: i32, %arg1: memref<32xi32, #tpu.memory_space<smem>>, %arg2: memref<100x128xf32, #tpu.memory_space<vmem>>, %arg3: memref<32x128xf32, #tpu.memory_space<vmem>>) attributes {dimension_semantics = [#tpu.dimension_semantics<parallel>], iteration_bounds = array<i64: 1>, scalar_prefetch = 1 : i64, scratch_operands = 0 : i64, tpu.core_type = #tpu.core_type<tc>, window_params = [{pipeline_mode = #tpu.pipeline_mode<synchronous>, transform_indices = @transform_0, window_bounds = array<i64: 100, 128>}, {transform_indices = @transform_1, window_bounds = array<i64: 32, 128>}]} {
    %c32_i32 = arith.constant 32 : i32
    %0 = arith.muli %arg0, %c32_i32 : i32
    %c0_i32 = arith.constant 0 : i32
    %c4_i32 = arith.constant 4 : i32
    %1 = arith.addi %c0_i32, %c4_i32 : i32
    %c1_i32 = arith.constant 1 : i32
    scf.for %arg4 = %c0_i32 to %1 step %c1_i32  : i32 {
      %c1_i32_1 = arith.constant 1 : i32
      %2 = arith.muli %arg4, %c1_i32_1 : i32
      %c0_i32_2 = arith.constant 0 : i32
      %3 = arith.addi %c0_i32_2, %2 : i32
      %c8_i32 = arith.constant 8 : i32
      %4 = arith.muli %3, %c8_i32 : i32
      %5 = tpu.assume_multiple %4, 8 : i32
      %6 = arith.addi %0, %5 : i32
      %c0_i32_3 = arith.constant 0 : i32
      %7 = arith.addi %6, %c0_i32_3 : i32
      %8 = arith.index_cast %7 : i32 to index
      %9 = memref.load %arg1[%8] : memref<32xi32, #tpu.memory_space<smem>>
      %10 = arith.index_cast %9 : i32 to index
      %c0 = arith.constant 0 : index
      %11 = vector.load %arg2[%10, %c0] : memref<100x128xf32, #tpu.memory_space<vmem>>, vector<1x128xf32>
      %12 = arith.addi %0, %5 : i32
      %c1_i32_4 = arith.constant 1 : i32
      %13 = arith.addi %12, %c1_i32_4 : i32
      %14 = arith.index_cast %13 : i32 to index
      %15 = memref.load %arg1[%14] : memref<32xi32, #tpu.memory_space<smem>>
      %16 = arith.index_cast %15 : i32 to index
      %c0_5 = arith.constant 0 : index
      %17 = vector.load %arg2[%16, %c0_5] : memref<100x128xf32, #tpu.memory_space<vmem>>, vector<1x128xf32>
      %18 = arith.addi %0, %5 : i32
      %c2_i32 = arith.constant 2 : i32
      %19 = arith.addi %18, %c2_i32 : i32
      %20 = arith.index_cast %19 : i32 to index
      %21 = memref.load %arg1[%20] : memref<32xi32, #tpu.memory_space<smem>>
      %22 = arith.index_cast %21 : i32 to index
      %c0_6 = arith.constant 0 : index
      %23 = vector.load %arg2[%22, %c0_6] : memref<100x128xf32, #tpu.memory_space<vmem>>, vector<1x128xf32>
      %24 = arith.addi %0, %5 : i32
      %c3_i32 = arith.constant 3 : i32
      %25 = arith.addi %24, %c3_i32 : i32
      %26 = arith.index_cast %25 : i32 to index
      %27 = memref.load %arg1[%26] : memref<32xi32, #tpu.memory_space<smem>>
      %28 = arith.index_cast %27 : i32 to index
      %c0_7 = arith.constant 0 : index
      %29 = vector.load %arg2[%28, %c0_7] : memref<100x128xf32, #tpu.memory_space<vmem>>, vector<1x128xf32>
      %30 = arith.addi %0, %5 : i32
      %c4_i32_8 = arith.constant 4 : i32
      %31 = arith.addi %30, %c4_i32_8 : i32
      %32 = arith.index_cast %31 : i32 to index
      %33 = memref.load %arg1[%32] : memref<32xi32, #tpu.memory_space<smem>>
      %34 = arith.index_cast %33 : i32 to index
      %c0_9 = arith.constant 0 : index
      %35 = vector.load %arg2[%34, %c0_9] : memref<100x128xf32, #tpu.memory_space<vmem>>, vector<1x128xf32>
      %36 = arith.addi %0, %5 : i32
      %c5_i32 = arith.constant 5 : i32
      %37 = arith.addi %36, %c5_i32 : i32
      %38 = arith.index_cast %37 : i32 to index
      %39 = memref.load %arg1[%38] : memref<32xi32, #tpu.memory_space<smem>>
      %40 = arith.index_cast %39 : i32 to index
      %c0_10 = arith.constant 0 : index
      %41 = vector.load %arg2[%40, %c0_10] : memref<100x128xf32, #tpu.memory_space<vmem>>, vector<1x128xf32>
      %42 = arith.addi %0, %5 : i32
      %c6_i32 = arith.constant 6 : i32
      %43 = arith.addi %42, %c6_i32 : i32
      %44 = arith.index_cast %43 : i32 to index
      %45 = memref.load %arg1[%44] : memref<32xi32, #tpu.memory_space<smem>>
      %46 = arith.index_cast %45 : i32 to index
      %c0_11 = arith.constant 0 : index
      %47 = vector.load %arg2[%46, %c0_11] : memref<100x128xf32, #tpu.memory_space<vmem>>, vector<1x128xf32>
      %48 = arith.addi %0, %5 : i32
      %c7_i32 = arith.constant 7 : i32
      %49 = arith.addi %48, %c7_i32 : i32
      %50 = arith.index_cast %49 : i32 to index
      %51 = memref.load %arg1[%50] : memref<32xi32, #tpu.memory_space<smem>>
      %52 = arith.index_cast %51 : i32 to index
      %c0_12 = arith.constant 0 : index
      %53 = vector.load %arg2[%52, %c0_12] : memref<100x128xf32, #tpu.memory_space<vmem>>, vector<1x128xf32>
      %54 = tpu.concatenate %11, %17, %23, %29, %35, %41, %47, %53 in 0 : vector<1x128xf32>, vector<1x128xf32>, vector<1x128xf32>, vector<1x128xf32>, vector<1x128xf32>, vector<1x128xf32>, vector<1x128xf32>, vector<1x128xf32> -> vector<8x128xf32>
      %55 = arith.index_cast %5 : i32 to index
      %c0_13 = arith.constant 0 : index
      %56 = vector.load %arg3[%55, %c0_13] : memref<32x128xf32, #tpu.memory_space<vmem>>, vector<8x128xf32>
      tpu.vector_store %arg3[%55, %c0_13], %54 {strides = array<i32>} : memref<32x128xf32, #tpu.memory_space<vmem>>, vector<8x128xf32>,
    }
    %c4_i32_0 = arith.constant 4 : i32
    return
  }
  func.func @transform_0(%arg0: i32, %arg1: memref<32xi32, #tpu.memory_space<smem>>) -> (i32, i32) {
    %c0_i32 = arith.constant 0 : i32
    %c0_i32_0 = arith.constant 0 : i32
    %c0_i32_1 = arith.constant 0 : i32
    return %c0_i32, %c0_i32_0 : i32, i32
  }
  func.func @transform_1(%arg0: i32, %arg1: memref<32xi32, #tpu.memory_space<smem>>) -> (i32, i32) {
    %c0_i32 = arith.constant 0 : i32
    %c0_i32_0 = arith.constant 0 : i32
    return %arg0, %c0_i32 : i32, i32
  }
}

</mosaic_0001>

<bundles_post_ra>
// kernel: tpu_custom_call.1
= control target key start
LH: loop header
LB: loop body
LE: loop exit
PB: predicated region body
PF: predicated region fallthrough
CT: control target
= control target key end

     0   :  { %s302_s0 = inlined_call_operand.hbm [shape: s32[32], index: 0, kind: input, shape index: {}]   ;;  %s303_s1 = inlined_call_operand.hbm [shape: f32[100,128], index: 1, kind: input, shape index: {}]   ;;  %s304_s2 = inlined_call_operand.hbm [shape: f32[32,128], index: 2, kind: output, shape index: {}]  }
   0x1   :  { %s151_s11 = scalar_lea.hbm %s302_s0, 16 }
   0x2   :  { %p152_p0 = scmp.ne.s32.totalorder %s302_s0, %s151_s11  ;;  %p155_p1 = scmp.lt.u32.totalorder %s151_s11, %s302_s0 }
   0x4   :  { %p157_p2 = pnand %p155_p1, %p152_p0 }
   0x6   :  { %160 = shalt.err (!%p157_p2)  }
   0x7   :  { %s219_s16 = smov [#allocation3]  }
   0x8   :  { %8 = dma.hbm_to_smem %s302_s0, 16, %s219_s16, [#allocation2] }
   0x9   :  { %209 = dma.done.wait [#allocation2], 16 }
   0xa   :  { %210 = vsyncadd [#allocation2], 4294967280 }
   0xb   :  { %10 = sfence }
   0xc   :  { %11 = vsyncpa [#allocation5], 0 }
   0xd   :  { %12 = vsyncpa [#allocation6], 0  ;;  %s220_s19 = smov [#allocation4]   ;;  %s161_s23 = scalar_lea.hbm %s303_s1, 1664 }
   0xe   :  { %s18_s20 = sshll.u32 %s220_s19, 4  ;;  %p162_p3 = scmp.ne.s32.totalorder %s303_s1, %s161_s23  ;;  %s19_s20 = int_to_ptr.vmem [resolvable:$true] %s18_s20 }
   0xf   :  { %p165_p4 = scmp.lt.u32.totalorder %s161_s23, %s303_s1 }
  0x11   :  { %p167_p5 = pnand %p165_p4, %p162_p3 }
  0x13   :  { %170 = shalt.err (!%p167_p5)
}
  0x14   :  { %s171_s0 = scalar_lea.vmem %s19_s20, 1664  ;;  %p176_p7 = scmp.lt.s32.totalorder %s19_s20, %s19_s20 }
  0x15   :  { %p172_p6 = scmp.ne.s32.totalorder %s19_s20, %s171_s0  ;;  %p177_p8 = scmp.lt.s32.totalorder %s171_s0, %s171_s0 }
  0x17   :  { %p178_p9 = por %p177_p8, %p176_p7 }
  0x19   :  { %p179_p10 = pnand %p178_p9, %p172_p6 }
  0x1b   :  { %182 = shalt.err (!%p179_p10)
}
  0x1c   :  { %s221_s28 = smov 128   ;;  %s222_s29 = smov 8  }
  0x1d   :  { %24 = dma.hbm_to_vmem [thread:$0]  %s303_s1, 1664, %s19_s20, [#allocation5], %s221_s28, %s221_s28, %s222_s29  }
  0x1e   :  { %211 = dma.done.wait [#allocation5], 1664  }
  0x1f   :  { %212 = vsyncadd [#allocation5], 4294965632  ;;  %s266_s4 = smov 0  }
  0x20 LB: > { %s272_s5 = sshll.u32 %s217_s4, 3  ;;  %vm89_vm0 = vcmask 1040384   ;;  %vm91_vm1 = vcmask 1041408   ;;  %vm93_vm2 = vcmask 1042432   ;;  %vm95_vm3 = vcmask 1043456   ;;  %s34_s4 = sadd.s32 1, %s217_s4   ;;  %s217_s4 = sphi %s266_s4, %s34_s4  }
  0x21   : > { %s37_s1 = sld [smem:[#allocation3 + %s272_s5]]  ;;  %s40_s6 = sadd.s32 1, %s272_s5  ;;  %vm97_vm4 = vcmask 1044480   ;;  %vm99_vm5 = vcmask 1045504   ;;  %vm101_vm6 = vcmask 1046528  }
  0x22   : > { %s41_s7 = sld [smem:[#allocation3 + %s40_s6]]  ;;  %s44_s8 = sadd.s32 2, %s272_s5 }
  0x23   : > { %s45_s9 = sld [smem:[#allocation3 + %s44_s8]]  ;;  %s48_s10 = sadd.s32 3, %s272_s5 }
  0x24   : > { %s49_s11 = sld [smem:[#allocation3 + %s48_s10]]  ;;  %s52_s12 = sadd.s32 4, %s272_s5 }
  0x25   : > { %s53_s13 = sld [smem:[#allocation3 + %s52_s12]]  ;;  %s56_s14 = sadd.s32 5, %s272_s5 }
  0x26   : > { %s57_s15 = sld [smem:[#allocation3 + %s56_s14]]  ;;  %s60_s16 = sadd.s32 6, %s272_s5 }
  0x27   : > { %s61_s17 = sld [smem:[#allocation3 + %s60_s16]]  ;;  %s64_s18 = sadd.s32 7, %s272_s5 }
  0x28   : > { %s38_s19 = scalar_lea.vmem [#allocation4], %s37_s1  ;;  %s42_s20 = scalar_lea.vmem [#allocation4], %s41_s7 }
  0x29   : > { %v39_v0 = vld [vmem:[%s38_s19] sm:$0x1]  ;;  %s65_s21 = sld [smem:[#allocation3 + %s64_s18]]  ;;  %s46_s22 = scalar_lea.vmem [#allocation4], %s45_s9 }
  0x2a   : > { %v43_v1 = vld [vmem:[%s42_s20] sm:$0x1]  ;;  %s50_s23 = scalar_lea.vmem [#allocation4], %s49_s11  ;;  %s103_s0 = scalar_lea.vmem [#allocation7], %s272_s5 }
  0x2b   : > { %v47_v2 = vld [vmem:[%s46_s22] sm:$0x1]  ;;  %v69_v3 = vrot.slane %v43_v1, 7  ;;  %s54_s24 = scalar_lea.vmem [#allocation4], %s53_s13  ;;  %p31_p11 = scmp.ge.s32.totalorder %s34_s4, 4  }
  0x2c   : > { %v51_v4 = vld [vmem:[%s50_s23] sm:$0x1]  ;;  %v72_v5 = vrot.slane %v47_v2, 6  ;;  %s58_s25 = scalar_lea.vmem [#allocation4], %s57_s15  ;;  %s223_s30 = smov (%p31_p11), [#allocation7]  }
  0x2d   : > { %v55_v6 = vld [vmem:[%s54_s24] sm:$0x1]  ;;  %v75_v7 = vrot.slane %v51_v4, 5  ;;  %v90_v8 = vsel %vm89_vm0, %v39_v0, %v69_v3  ;;  %s62_s26 = scalar_lea.vmem [#allocation4], %s61_s17  ;;  %s110_s3 = sshll.u32 (%p31_p11), %s223_s30, 4  ;;  %s111_s3 = int_to_ptr.vmem [resolvable:$true] %s110_s3 }
  0x2e   : > { %v59_v9 = vld [vmem:[%s58_s25] sm:$0x1]  ;;  %v78_v10 = vrot.slane %v55_v6, 4  ;;  %v92_v11 = vsel %vm91_vm1, %v90_v8, %v72_v5  ;;  %33 = sbr.rel (!%p31_p11) target bundleno = 32 (0x20), region = 44  ;;  %s183_s1 = scalar_lea.vmem (%p31_p11), %s111_s3, 512 }
  0x2f   : > { %v63_v12 = vld [vmem:[%s62_s26] sm:$0x1]  ;;  %v81_v13 = vrot.slane %v59_v9, 3  ;;  %v94_v14 = vsel %vm93_vm2, %v92_v11, %v75_v7  ;;  %s66_s27 = scalar_lea.vmem [#allocation4], %s65_s21  ;;  %p184_p12 = scmp.ne.s32.totalorder (%p31_p11), %s111_s3, %s183_s1 }
  0x30   : > { %v84_v15 = vrot.slane %v63_v12, 2  ;;  %v96_v16 = vsel %vm95_vm3, %v94_v14, %v78_v10  ;;  %v67_v17 = vld [vmem:[%s66_s27] sm:$0x1]  ;;  %p188_p13 = scmp.lt.s32.totalorder (%p31_p11), %s111_s3, %s111_s3  ;;  %p189_p0 = scmp.lt.s32.totalorder (%p31_p11), %s183_s1, %s183_s1 }
  0x31   : > { %v98_v18 = vsel %vm97_vm4, %v96_v16, %v81_v13  ;;  %v87_v19 = vrot.slane %v67_v17, 1 }
  0x32   : > { %v100_v20 = vsel %vm99_vm5, %v98_v18, %v84_v15  ;;  %p190_p1 = por (%p31_p11), %p189_p0, %p188_p13 }
  0x33   : > { %v102_v21 = vsel %vm101_vm6, %v100_v20, %v87_v19 }
  0x34   : > { %104 = vst [vmem:[%s103_s0] sm:$0xff] %v102_v21  ;;  %p191_p2 = pnand (%p31_p11), %p190_p1, %p184_p12 }
  0x36   :  { %194 = shalt.err (!%p191_p2)
}
  0x37   :  { %s195_s5 = scalar_lea.hbm %s304_s2, 512 }
  0x38   :  { %p196_p3 = scmp.ne.s32.totalorder %s304_s2, %s195_s5  ;;  %p199_p4 = scmp.lt.u32.totalorder %s195_s5, %s304_s2 }
  0x3a   :  { %p201_p5 = pnand %p199_p4, %p196_p3 }
  0x3c   :  { %204 = shalt.err (!%p201_p5)
}
  0x3d   :  { %116 = dma.vmem_to_hbm [thread:$0]  %s111_s3, 512, %s304_s2, [#allocation6], %s221_s28, %s221_s28, %s222_s29  }
  0x3e   :  { %213 = dma.done.wait [#allocation6], 512  }
  0x3f   :  { %214 = vsyncadd [#allocation6], 4294966784 }
  0x40   :  { %120 = vsyncpa [#allocation5], 1 }
  0x41   :  { %121 = vsyncpa [#allocation6], 1 }

</bundles_post_ra>
